<compile_context>
chip_gen: v7x
topology: tpu7x:2x2x1
jax: 0.10.0
libtpu: 0.0.40
codegen_flags: <defaults>
</compile_context>

<pallas_src>
import functools

import jax
import jax.numpy as jnp
from jax.experimental import pallas as pl
from jax.experimental.pallas import tpu as pltpu

EPS = 1e-5  # RevIN eps


def fused_kernel(x_ref, w_ref, b_ref, o_ref):
    """RevIN norm + folded start_fc/projection + RevIN denorm for one row block.

    x_ref: [Rt, L]  rows are (batch, node) pairs, lanes carry time.
    w_ref: [L, P]   folded projection weight (compute dtype, resident).
    b_ref: [1, P]   folded bias (f32).
    o_ref: [Rt, P]  lane-dense output block.
    """
    x = x_ref[...]
    # RevIN "norm" statistics per (batch, node) row: biased variance, eps=1e-5.
    mean = jnp.mean(x, axis=1, keepdims=True)                  # [Rt, 1]
    var = jnp.mean((x - mean) ** 2, axis=1, keepdims=True)     # [Rt, 1]
    std = jnp.sqrt(var + EPS)
    xn = (x - mean) / std                                      # [Rt, L]
    # Folded start_fc + projections on the MXU (f32 accumulation).
    y = jnp.dot(xn.astype(w_ref.dtype), w_ref[...],
                preferred_element_type=jnp.float32)            # [Rt, P]
    y = y + b_ref[...]
    # RevIN "denorm": broadcast per-row std/mean across prediction steps.
    o_ref[...] = y * std + mean


def _pick_row_block(total_rows, l, p, itemsize=4,
                    max_rows=2048, budget_bytes=4 << 20):
    """Largest divisor of total_rows that is sublane-aligned and fits the budget."""
    divisors = [d for d in range(1, total_rows + 1) if total_rows % d == 0]
    for rt in sorted(divisors, reverse=True):
        if rt != total_rows and rt % 8 != 0:
            # (8, 128) sublane rule unless the block spans the full axis.
            continue
        if rt <= max_rows and rt * (l + p) * itemsize <= budget_bytes:
            return rt
    return total_rows


@functools.partial(jax.jit, static_argnames=("compute_dtype",))
def model_forward(x, params, compute_dtype=jnp.float32):
    B, L, N = x.shape
    D = params["w_fc"].shape[1]
    P = params["w_proj"].shape[1]

    # ---- Fold start_fc into the projection (exact while `multi` is identity) ----
    w3 = params["w_proj"].reshape(L, D, P)                         # [L, D, P]
    w_eff = jnp.einsum("d,ldp->lp", params["w_fc"][0], w3)         # [L, P]
    b_eff = (jnp.einsum("d,ldp->p", params["b_fc"][0], w3)[None, :]
             + params["b_proj"])                                   # [1, P]
    # bf16 operands (f32 accumulation) recommended on v6e/v7x; f32 default.
    w_eff = w_eff.astype(compute_dtype)
    b_eff = b_eff.astype(jnp.float32)

    # ---- Flatten to a lane-dense [B*N, L] slab (rows = (batch, node) pairs) ----
    x2 = jnp.transpose(x, (0, 2, 1)).reshape(B * N, L).astype(jnp.float32)

    rows = B * N
    rt = _pick_row_block(rows, L, P)
    grid = (rows // rt,)

    w_itemsize = jnp.dtype(compute_dtype).itemsize
    vmem_est = (2 * rt * (L + P) * 4          # double-buffered in/out blocks
                + 2 * L * P * w_itemsize      # resident folded weight (x2 worst case)
                + 2 * P * 4)                  # bias
    vmem_limit = int(min(max(4 * vmem_est + (2 << 20), 8 << 20), 64 << 20))

    y = pl.pallas_call(
        fused_kernel,
        out_shape=jax.ShapeDtypeStruct((rows, P), jnp.float32),
        grid_spec=pltpu.PrefetchScalarGridSpec(
            num_scalar_prefetch=0,
            grid=grid,
            in_specs=[
                pl.BlockSpec((rt, L), lambda r: (r, 0)),
                pl.BlockSpec((L, P), lambda r: (0, 0)),   # constant (resident weight)
                pl.BlockSpec((1, P), lambda r: (0, 0)),
            ],
            out_specs=pl.BlockSpec((rt, P), lambda r: (r, 0)),
        ),
        compiler_params=pltpu.CompilerParams(
            dimension_semantics=("parallel",),
            vmem_limit_bytes=vmem_limit,
        ),
    )(x2, w_eff, b_eff)                                            # [B*N, P]

    # Final permute to the module's [B, pred_len, num_nodes] output layout.
    out = jnp.transpose(y.reshape(B, N, P), (0, 2, 1))

    # TODO(synk): `multi` MoE layers (not defined in the provided source) are
    # identity; their auxiliary balance loss is therefore 0.
    balance_loss = jnp.float32(0.0)
    return out, balance_loss


def reference_forward(x, params):
    """Pure-JAX reference of the unfused module semantics (for validation)."""
    mean = jnp.mean(x, axis=1, keepdims=True)
    std = jnp.sqrt(jnp.var(x, axis=1, keepdims=True) + EPS)
    xn = (x - mean) / std
    emb = xn[..., None] * params["w_fc"][0] + params["b_fc"][0]    # [B, L, N, D]
    B, L, N = x.shape
    h = jnp.transpose(emb, (0, 2, 1, 3)).reshape(B, N, -1)         # [B, N, L*D]
    y = h @ params["w_proj"] + params["b_proj"][0]                 # [B, N, P]
    y = jnp.transpose(y, (0, 2, 1))                                # [B, P, N]
    return y * std + mean


if __name__ == "__main__":
    # Small config consistent with the module's forward:
    #   batch=2, seq_len=8, num_nodes=4, d_model=16, pred_len=4
    B, L, N, D, P = 2, 8, 4, 16, 4

    key = jax.random.PRNGKey(0)
    kx, kw1, kb1, kw2, kb2 = jax.random.split(key, 5)

    x = jax.random.normal(kx, (B, L, N), dtype=jnp.float32)
    params = {
        # start_fc: nn.Linear(1, d_model)  -> weight [D, 1] stored here as [1, D]
        "w_fc": jax.random.normal(kw1, (1, D), dtype=jnp.float32) * 0.5,
        "b_fc": jax.random.normal(kb1, (1, D), dtype=jnp.float32) * 0.1,
        # projections: nn.Linear(seq_len*d_model, pred_len) -> stored as [L*D, P]
        "w_proj": jax.random.normal(kw2, (L * D, P), dtype=jnp.float32) * 0.05,
        "b_proj": jax.random.normal(kb2, (1, P), dtype=jnp.float32) * 0.1,
    }

    ref = reference_forward(x, params)

    # f32 MXU path (strict check).
    out, balance_loss = model_forward(x, params)
    out = jax.block_until_ready(out)
    balance_loss = jax.block_until_ready(balance_loss)
    assert out.shape == (B, P, N), out.shape
    assert jnp.allclose(out, ref, atol=1e-4, rtol=1e-4), "f32 mismatch vs reference"

    # bf16-operand MXU path (v6e/v7x recommendation), f32 accumulation.
    out_bf16, _ = model_forward(x, params, compute_dtype=jnp.bfloat16)
    out_bf16 = jax.block_until_ready(out_bf16)
    assert jnp.allclose(out_bf16, ref, atol=2e-2, rtol=2e-2), "bf16 mismatch vs reference"

    print("KERNEL_OK")
</pallas_src>

<mosaic_0001>
module attributes {stable_mosaic.version = 11 : i64} {
  func.func @fused_kernel(%arg0: i32, %arg1: memref<8x8xf32, #tpu.memory_space<vmem>>, %arg2: memref<8x4xf32, #tpu.memory_space<vmem>>, %arg3: memref<1x4xf32, #tpu.memory_space<vmem>>, %arg4: memref<8x4xf32, #tpu.memory_space<vmem>>) attributes {dimension_semantics = [#tpu.dimension_semantics<parallel>], iteration_bounds = array<i64: 1>, scalar_prefetch = 0 : i64, scratch_operands = 0 : i64, tpu.core_type = #tpu.core_type<tc>, window_params = [{transform_indices = @transform_0, window_bounds = array<i64: 8, 8>}, {pipeline_mode = #tpu.pipeline_mode<synchronous>, transform_indices = @transform_1, window_bounds = array<i64: 8, 4>}, {pipeline_mode = #tpu.pipeline_mode<synchronous>, transform_indices = @transform_2, window_bounds = array<i64: 1, 4>}, {transform_indices = @transform_3, window_bounds = array<i64: 8, 4>}]} {
    %c0 = arith.constant 0 : index
    %c0_0 = arith.constant 0 : index
    %0 = vector.load %arg1[%c0, %c0_0] : memref<8x8xf32, #tpu.memory_space<vmem>>, vector<8x8xf32>
    %cst = arith.constant dense<0.000000e+00> : vector<8xf32>
    %1 = vector.multi_reduction <add>, %0, %cst [1] : vector<8x8xf32> to vector<8xf32>
    %2 = vector.shape_cast %1 : vector<8xf32> to vector<8x1xf32>
    %cst_1 = arith.constant 8.000000e+00 : f32
    %3 = vector.broadcast %cst_1 : f32 to vector<8x1xf32>
    %4 = arith.divf %2, %3 : vector<8x1xf32>
    %5 = vector.broadcast %4 : vector<8x1xf32> to vector<8x8xf32>
    %6 = arith.subf %0, %5 : vector<8x8xf32>
    %7 = arith.mulf %6, %6 : vector<8x8xf32>
    %cst_2 = arith.constant dense<0.000000e+00> : vector<8xf32>
    %8 = vector.multi_reduction <add>, %7, %cst_2 [1] : vector<8x8xf32> to vector<8xf32>
    %9 = vector.shape_cast %8 : vector<8xf32> to vector<8x1xf32>
    %cst_3 = arith.constant 8.000000e+00 : f32
    %10 = vector.broadcast %cst_3 : f32 to vector<8x1xf32>
    %11 = arith.divf %9, %10 : vector<8x1xf32>
    %cst_4 = arith.constant 9.99999974E-6 : f32
    %12 = vector.broadcast %cst_4 : f32 to vector<8x1xf32>
    %13 = arith.addf %11, %12 : vector<8x1xf32>
    %14 = math.sqrt %13 : vector<8x1xf32>
    %15 = vector.broadcast %4 : vector<8x1xf32> to vector<8x8xf32>
    %16 = arith.subf %0, %15 : vector<8x8xf32>
    %17 = vector.broadcast %14 : vector<8x1xf32> to vector<8x8xf32>
    %18 = arith.divf %16, %17 : vector<8x8xf32>
    %c0_5 = arith.constant 0 : index
    %c0_6 = arith.constant 0 : index
    %19 = vector.load %arg2[%c0_5, %c0_6] : memref<8x4xf32, #tpu.memory_space<vmem>>, vector<8x4xf32>
    %cst_7 = arith.constant dense<0.000000e+00> : vector<8x4xf32>
    %20 = tpu.matmul %18, %19, %cst_7 {dimension_numbers = #tpu.dot_dimension_numbers<[1], [0], [0], [1], [0, 0, 1, 1], [], []>} : vector<8x8xf32>, vector<8x4xf32>, vector<8x4xf32> -> vector<8x4xf32>
    %c0_8 = arith.constant 0 : index
    %c0_9 = arith.constant 0 : index
    %21 = vector.load %arg3[%c0_8, %c0_9] : memref<1x4xf32, #tpu.memory_space<vmem>>, vector<1x4xf32>
    %22 = vector.broadcast %21 : vector<1x4xf32> to vector<8x4xf32>
    %23 = arith.addf %20, %22 : vector<8x4xf32>
    %24 = vector.broadcast %14 : vector<8x1xf32> to vector<8x4xf32>
    %25 = arith.mulf %23, %24 : vector<8x4xf32>
    %26 = vector.broadcast %4 : vector<8x1xf32> to vector<8x4xf32>
    %27 = arith.addf %25, %26 : vector<8x4xf32>
    %c0_10 = arith.constant 0 : index
    %c0_11 = arith.constant 0 : index
    %28 = vector.load %arg4[%c0_10, %c0_11] : memref<8x4xf32, #tpu.memory_space<vmem>>, vector<8x4xf32>
    tpu.vector_store %arg4[%c0_10, %c0_11], %27 {strides = array<i32>} : memref<8x4xf32, #tpu.memory_space<vmem>>, vector<8x4xf32>,
    return
  }
  func.func @transform_0(%arg0: i32) -> (i32, i32) {
    %c0_i32 = arith.constant 0 : i32
    %c0_i32_0 = arith.constant 0 : i32
    return %arg0, %c0_i32 : i32, i32
  }
  func.func @transform_1(%arg0: i32) -> (i32, i32) {
    %c0_i32 = arith.constant 0 : i32
    %c0_i32_0 = arith.constant 0 : i32
    %c0_i32_1 = arith.constant 0 : i32
    return %c0_i32, %c0_i32_0 : i32, i32
  }
  func.func @transform_2(%arg0: i32) -> (i32, i32) {
    %c0_i32 = arith.constant 0 : i32
    %c0_i32_0 = arith.constant 0 : i32
    %c0_i32_1 = arith.constant 0 : i32
    return %c0_i32, %c0_i32_0 : i32, i32
  }
  func.func @transform_3(%arg0: i32) -> (i32, i32) {
    %c0_i32 = arith.constant 0 : i32
    %c0_i32_0 = arith.constant 0 : i32
    return %arg0, %c0_i32 : i32, i32
  }
}

</mosaic_0001>

<bundles_post_ra>
// kernel: model_forward.1
= control target key start
LH: loop header
LB: loop body
LE: loop exit
PB: predicated region body
PF: predicated region fallthrough
CT: control target
= control target key end

     0   :  { %vm15_vm0 = vcmask 64512   ;;  %v141_v7 = vmov 0.0   ;;  %vm142_vm1 = vmmov 0   ;;  %vm120_vm4 = vcmask 31744   ;;  %s178_s0 = inlined_call_operand.vmem [shape: f32[8,8], index: 0, kind: input, shape index: {}]   ;;  %s179_s1 = inlined_call_operand.vmem [shape: f32[8,4], index: 1, kind: input, shape index: {}]   ;;  %s180_s2 = inlined_call_operand.vmem [shape: f32[1,4], index: 2, kind: input, shape index: {}]   ;;  %s181_s3 = inlined_call_operand.vmem [shape: f32[8,4], index: 3, kind: output, shape index: {}]  }
   0x1   :  { %v14_v0 = vld [vmem:[%s178_s0] sm:$0xff]  ;;  %130 = vmatprep.subr.mxu0 %v141_v7  ;;  %132 = vmatprep.mubr.msk.f32.mxu0 %vm142_vm1, %v141_v7 }
   0x2   :  { %v16_v1 = vsel %vm15_vm0, %v14_v0, 0.0  ;;  %v37_v8 = vld [vmem:[%s179_s1] sm:$0xff] }
   0x3   :  { %17 = vadd.xlane.f32.xlu0 %v16_v1  ;;  %131 = vmatpush3.msra.mxu0 %v37_v8  ;;  %v126_v19 = vld [vmem:[%s180_s2] ss:$0 sm:$0xff] }
  0x90   :  { %v18_v2 = vpop.xlane.xlu0 %17 }
  0x91   :  { %v20_v3 = vmul.f32 0.125, %v18_v2 }
  0x93   :  { %v21_v4 = vsub.f32 %v14_v0, %v20_v3 }
  0x95   :  { %v22_v5 = vmul.f32 %v21_v4, %v21_v4 }
  0x97   :  { %v23_v6 = vsel %vm15_vm0, %v22_v5, 0.0 }
  0x98   :  { %24 = vadd.xlane.f32.xlu0 %v23_v6 }
 0x125   :  { %v25_v9 = vpop.xlane.xlu0 %24 }
 0x126   :  { %v26_v10 = vmul.f32 0.125, %v25_v9 }
 0x128   :  { %v27_v11 = vadd.f32 1e-05, %v26_v10 }
 0x12a   :  { %137 = vrsqrt.f32 %v27_v11  ;;  %vm30_vm2 = vcmp.eq.f32.partialorder %v27_v11, inf  ;;  %v33_v14 = vand.u32 2147483648, %v27_v11  ;;  %vm32_vm3 = vcmp.eq.f32.partialorder %v27_v11, 0.0 }
 0x134   :  { %v138_v12 = vpop.eup %137 }
 0x135   :  { %v29_v13 = vmul.f32 %v138_v12, %v27_v11 }
 0x137   :  { %v31_v15 = vsel %vm30_vm2, %v27_v11, %v29_v13 }
 0x138   :  { %v34_v16 = vsel %vm32_vm3, %v33_v14, %v31_v15 }
 0x139   :  { %139 = vrcp.f32 %v34_v16 }
 0x143   :  { %v140_v17 = vpop.eup %139 }
 0x144   :  { %v36_v18 = vmul.f32 %v140_v17, %v21_v4 }
 0x146   :  { %133 = vmatmul.mubr.msk.f32.vlgmr.msra.gmra.mrb[0].mxu0 %vm15_vm0, %v36_v18 }
 0x219   :  { %v114_v20 = vpop.f32.mrb[0].mxu0 }
 0x21a   :  { %v115_v21 = vadd.f32 %v126_v19, %v114_v20  ;;  %v134_v22 = vpop.f32.mrb[1].mxu0 }
 0x21c   :  { %v118_v23 = vmul.f32 %v115_v21, %v34_v16 }
 0x21e   :  { %v119_v24 = vadd.f32 %v118_v23, %v20_v3 }
 0x220   :  { %121 = vst.msk [vmem:[%s181_s3] sm:$0xff] %vm120_vm4, %v119_v24 }

</bundles_post_ra>
